<compile_context>
chip_gen: v7x
topology: tpu7x:2x2x1
jax: 0.10.0
libtpu: 0.0.40
codegen_flags: <defaults>
</compile_context>

<pallas_src>
import jax
import jax.numpy as jnp
from jax.experimental import pallas as pl
from jax.experimental.pallas import tpu as pltpu


_LANE = 128
_SUBLANE = 8
_VOCAB_TILE = 512                 # contraction-axis tile for the one-hot path
_MAX_ROW_BLOCK = 1024             # output row block for the one-hot path
_DMA_ROW_BLOCK = 256              # output row block for the DMA-gather path
_RESIDENT_TABLE_BYTES = 8 * 2**20 # one-hot path only if the table is <= this


def _round_up(x, m):
    return ((x + m - 1) // m) * m


def _pad_rows(v):
    """Vocab-row padding shared by the module and the one-hot kernel tiling."""
    v = max(int(v), 1)
    if v <= _VOCAB_TILE:
        return max(_SUBLANE, _round_up(v, _SUBLANE))
    return _round_up(v, _VOCAB_TILE)


# ---------------------------------------------------------------------------
# Path 1: VMEM-resident / streamed table, one-hot MXU gather, vocab-tiled.
# ---------------------------------------------------------------------------
def _onehot_gather_kernel(ids_ref, w_ref, out_ref, acc_ref):
    """acc[r, :] += onehot(ids[r] - k*tile_v) @ W_tile; store out on last k.

    ids_ref : VMEM int32 [block_n, 1]   fused row ids for this output block
    w_ref   : VMEM [tile_v, d_pad]      current vocab tile of the fused table
    out_ref : VMEM [block_n, d_pad]
    acc_ref : VMEM f32 [block_n, d_pad] accumulator across vocab tiles
    """
    k = pl.program_id(1)

    @pl.when(k == 0)
    def _():
        acc_ref[...] = jnp.zeros_like(acc_ref)

    block_n = out_ref.shape[0]
    tile_v = w_ref.shape[0]
    local = ids_ref[...] - k * tile_v                              # (block_n, 1)
    col = jax.lax.broadcasted_iota(jnp.int32, (block_n, tile_v), 1)
    onehot = (col == local).astype(w_ref.dtype)                    # (block_n, tile_v)
    # bf16 x bf16 -> f32 is an exact single MXU pass for a one-hot LHS.  Only
    # force HIGHEST when someone insists on a float32 compute table.
    precision = (jax.lax.Precision.HIGHEST
                 if w_ref.dtype == jnp.float32 else jax.lax.Precision.DEFAULT)
    acc_ref[...] += jnp.dot(onehot, w_ref[...],
                            preferred_element_type=jnp.float32,
                            precision=precision)

    @pl.when(k == pl.num_programs(1) - 1)
    def _():
        out_ref[...] = acc_ref[...].astype(out_ref.dtype)


def _onehot_lookup(weight, ids, out_dtype, max_block_n):
    v, d = weight.shape
    n = int(ids.shape[0])

    d_pad = max(_LANE, _round_up(d, _LANE))
    v_pad = _pad_rows(v)
    if d_pad != d or v_pad != v:
        weight = jnp.pad(weight, ((0, v_pad - v), (0, d_pad - d)))

    tile_v = min(_VOCAB_TILE, v_pad)
    block_n = min(max_block_n, _round_up(n, _SUBLANE))
    n_pad = _round_up(n, block_n)
    # Padded ids point at row 0 (a valid row); padded outputs are sliced off.
    ids_col = jnp.zeros((n_pad, 1), jnp.int32).at[:n, 0].set(ids)

    n_blocks = n_pad // block_n
    v_tiles = v_pad // tile_v

    # Per-generation VMEM budget: double-buffered blocks + accumulator +
    # iota/compare/one-hot temporaries; capped at v7x's 64 MiB.
    w_item = jnp.dtype(weight.dtype).itemsize
    o_item = jnp.dtype(out_dtype).itemsize
    need = (2 * block_n * 4
            + 2 * tile_v * d_pad * w_item
            + 2 * block_n * d_pad * o_item
            + block_n * d_pad * 4
            + 4 * block_n * tile_v * 4)
    vmem_limit = int(min(64 * 2**20, max(need + 4 * 2**20, 16 * 2**20)))

    out = pl.pallas_call(
        _onehot_gather_kernel,
        out_shape=jax.ShapeDtypeStruct((n_pad, d_pad), out_dtype),
        grid_spec=pltpu.PrefetchScalarGridSpec(
            num_scalar_prefetch=0,
            grid=(n_blocks, v_tiles),              # reduction (vocab) axis last
            in_specs=[
                # ids for this output block (kept as a VMEM column: the one-hot
                # build needs them as a vector, not SMEM scalars)
                pl.BlockSpec((block_n, 1), lambda i, k: (i, 0)),
                # current vocab tile of the fused table
                pl.BlockSpec((tile_v, d_pad), lambda i, k: (k, 0)),
            ],
            out_specs=pl.BlockSpec((block_n, d_pad), lambda i, k: (i, 0)),
            scratch_shapes=[pltpu.VMEM((block_n, d_pad), jnp.float32)],
        ),
        compiler_params=pltpu.CompilerParams(
            dimension_semantics=("parallel", "arbitrary"),
            vmem_limit_bytes=vmem_limit,
        ),
    )(ids_col, weight)
    return out[:n, :d]


# ---------------------------------------------------------------------------
# Path 2: large-vocab DMA gather (ids in SMEM via scalar prefetch, table in
# HBM, per-row async copies into a VMEM staging buffer).
# ---------------------------------------------------------------------------
def _dma_gather_kernel(ids_ref, w_hbm, out_ref, buf_ref, sem_ref):
    """out[r, :] = W[ids[r], :] via per-row HBM -> VMEM async copies.

    ids_ref : SMEM int32 [n_pad]        scalar-prefetched fused row ids
    w_hbm   : HBM  [V, d_pad]           fused table (memory_space=pl.ANY)
    out_ref : VMEM [block_n, d_pad]
    buf_ref : VMEM [block_n, d_pad]     staging buffer (table dtype)
    sem_ref : DMA semaphore [1]
    """
    block_n = out_ref.shape[0]
    base = pl.program_id(0) * block_n
    sem = sem_ref.at[0]

    @pl.loop(0, block_n)
    def _(r):
        pltpu.make_async_copy(w_hbm.at[ids_ref[base + r]], buf_ref.at[r],
                              sem).start()

    @pl.loop(0, block_n)
    def _(r):
        # Same-shaped descriptor; each wait retires one completed row copy.
        pltpu.make_async_copy(w_hbm.at[0], buf_ref.at[r], sem).wait()

    out_ref[...] = buf_ref[...].astype(out_ref.dtype)


def _dma_gather_lookup(weight, ids, out_dtype, max_block_n):
    v, d = weight.shape
    n = int(ids.shape[0])

    d_pad = max(_LANE, _round_up(d, _LANE))
    if d_pad != d:
        weight = jnp.pad(weight, ((0, 0), (0, d_pad - d)))

    block_n = min(max_block_n, _round_up(n, _SUBLANE))
    n_pad = _round_up(n, block_n)
    ids_flat = jnp.zeros((n_pad,), jnp.int32).at[:n].set(ids)
    n_blocks = n_pad // block_n

    w_item = jnp.dtype(weight.dtype).itemsize
    o_item = jnp.dtype(out_dtype).itemsize
    need = 2 * block_n * d_pad * o_item + block_n * d_pad * w_item
    vmem_limit = int(min(64 * 2**20, max(need + 4 * 2**20, 16 * 2**20)))

    out = pl.pallas_call(
        _dma_gather_kernel,
        out_shape=jax.ShapeDtypeStruct((n_pad, d_pad), out_dtype),
        grid_spec=pltpu.PrefetchScalarGridSpec(
            num_scalar_prefetch=1,                       # ids -> SMEM
            grid=(n_blocks,),
            in_specs=[pl.BlockSpec(memory_space=pl.ANY)],  # table stays in HBM
            out_specs=pl.BlockSpec((block_n, d_pad), lambda i, ids: (i, 0)),
            scratch_shapes=[
                pltpu.VMEM((block_n, d_pad), weight.dtype),
                pltpu.SemaphoreType.DMA((1,)),
            ],
        ),
        compiler_params=pltpu.CompilerParams(
            dimension_semantics=("parallel",),
            vmem_limit_bytes=vmem_limit,
        ),
    )(ids_flat, weight)
    return out[:n, :d]


# ---------------------------------------------------------------------------
# Dispatcher + module
# ---------------------------------------------------------------------------
def fused_embedding_lookup(weight, ids, *, out_dtype=None,
                           max_block_n=_MAX_ROW_BLOCK, force_path=None):
    """Pallas embedding lookup: out[i, :] = weight[ids[i], :].

    `weight` is the fused [V, D] table, `ids` a 1-D vector of fused row ids.
    Small tables use the VMEM-resident one-hot MXU path; large tables use the
    HBM DMA-gather path (O(N*D) bytes, no MXU work).
    """
    if out_dtype is None:
        out_dtype = weight.dtype
    ids = jnp.asarray(ids, jnp.int32).reshape(-1)
    if int(ids.shape[0]) == 0:
        return jnp.zeros((0, weight.shape[1]), out_dtype)

    table_bytes = (weight.shape[0] * weight.shape[1]
                   * jnp.dtype(weight.dtype).itemsize)
    use_dma = (force_path == "dma"
               or (force_path is None and table_bytes > _RESIDENT_TABLE_BYTES))
    if use_dma:
        return _dma_gather_lookup(weight, ids, out_dtype,
                                  min(max_block_n, _DMA_ROW_BLOCK))
    return _onehot_lookup(weight, ids, out_dtype, max_block_n)


class HeteroEmbedding:
    """JAX/Pallas port of the PyTorch HeteroEmbedding module.

    Internally stores ONE fused [sum(num_rows), d_pad] table (bf16 compute
    copy) plus per-key row offsets; forward() is a single fused Pallas gather.
    """

    def __init__(self, num_embeddings, embedding_dim, *, key=None,
                 dtype=jnp.float32, compute_dtype=jnp.bfloat16):
        if key is None:
            key = jax.random.PRNGKey(0)
        self.embedding_dim = int(embedding_dim)
        self.dtype = dtype
        self._keys = list(num_embeddings.keys())
        self._num_rows = {k: int(v) for k, v in num_embeddings.items()}

        self._offsets = {}
        off = 0
        for k in self._keys:
            self._offsets[k] = off
            off += self._num_rows[k]
        self._total_rows = off

        # nn.Embedding default init: N(0, 1), one PRNG key per sub-table.
        subkeys = jax.random.split(key, max(len(self._keys), 1))
        tables = [
            jax.random.normal(sk, (self._num_rows[k], self.embedding_dim),
                              dtype=jnp.float32)
            for sk, k in zip(subkeys, self._keys)
        ]
        fused = (jnp.concatenate(tables, axis=0) if tables
                 else jnp.zeros((0, self.embedding_dim), jnp.float32))

        # Pad rows to the kernel's vocab tiling and the embedding dim up to a
        # multiple of 128 (lane-dense, unmasked stores).  Padding rows are
        # zeros and are never addressed by valid ids / are sliced off.
        v_pad = _pad_rows(self._total_rows)
        d_pad = max(_LANE, _round_up(self.embedding_dim, _LANE))
        fused = jnp.pad(fused, ((0, v_pad - fused.shape[0]),
                                (0, d_pad - fused.shape[1])))
        # bf16 compute table: the one-hot MXU gather is exact in the table's
        # own dtype and avoids Precision.HIGHEST multi-pass matmuls.
        self._fused = fused.astype(compute_dtype)

    @property
    def weight(self):
        """dict[key, (num_rows, embedding_dim)] — views of the fused table."""
        return {
            k: self._fused[self._offsets[k]:self._offsets[k] + self._num_rows[k],
                           :self.embedding_dim].astype(self.dtype)
            for k in self._keys
        }

    def forward(self, input_ids):
        keys = list(input_ids.keys())
        shifted, shapes, lengths = [], {}, []
        for k in keys:
            ids_k = jnp.asarray(input_ids[k], jnp.int32)
            shapes[k] = tuple(ids_k.shape)
            flat = ids_k.reshape(-1)
            lengths.append(int(flat.shape[0]))
            shifted.append(flat + jnp.int32(self._offsets[k]))

        if not keys or sum(lengths) == 0:
            return {k: jnp.zeros(shapes[k] + (self.embedding_dim,), self.dtype)
                    for k in keys}

        # NOTE: out-of-range ids silently return a zero row (one-hot path) or
        # an arbitrary row (DMA path); PyTorch's nn.Embedding would raise.
        all_ids = jnp.concatenate(shifted, axis=0)
        out = fused_embedding_lookup(self._fused, all_ids, out_dtype=self.dtype)
        out = out[:, :self.embedding_dim]

        result, start = {}, 0
        for k, l in zip(keys, lengths):
            result[k] = out[start:start + l].reshape(
                shapes[k] + (self.embedding_dim,))
            start += l
        return result

    __call__ = forward


if __name__ == "__main__":
    embedding_dim = 128
    num_embeddings = {
        "user": 16,
        ("user", "follows", "user"): 24,
    }

    layer = HeteroEmbedding(num_embeddings, embedding_dim,
                            key=jax.random.PRNGKey(0))

    kid = jax.random.PRNGKey(0)
    k1, k2 = jax.random.split(kid)
    input_ids = {
        "user": jax.random.randint(k1, (5,), 0, num_embeddings["user"],
                                   dtype=jnp.int32),
        ("user", "follows", "user"): jax.random.randint(
            k2, (10,), 0, num_embeddings[("user", "follows", "user")],
            dtype=jnp.int32),
    }

    # 1) Forward pass (small table -> one-hot MXU path).
    embeds = layer(input_ids)
    # dict keys mix str and tuple -> cannot use tree_map (pytree key sorting
    # fails); block on the values directly.
    for v in embeds.values():
        jax.block_until_ready(v)

    ok = True
    for typ, ids in input_ids.items():
        ref = jnp.take(layer.weight[typ], ids, axis=0)
        got = embeds[typ]
        assert got.shape == tuple(ids.shape) + (embedding_dim,), (typ, got.shape)
        ok &= bool(jnp.allclose(got, ref, atol=1e-6, rtol=1e-6))
    assert ok, "one-hot Pallas embedding lookup mismatch vs reference"

    # 2) Also exercise the large-vocab DMA-gather path on the same fused table.
    all_ids = jnp.concatenate([
        jnp.asarray(input_ids["user"], jnp.int32),
        jnp.asarray(input_ids[("user", "follows", "user")], jnp.int32)
        + jnp.int32(layer._offsets[("user", "follows", "user")]),
    ])
    dma_out = fused_embedding_lookup(layer._fused, all_ids,
                                     out_dtype=jnp.float32, force_path="dma")
    jax.block_until_ready(dma_out)
    ref_all = jnp.take(layer._fused, all_ids, axis=0).astype(jnp.float32)
    assert dma_out.shape == (int(all_ids.shape[0]), layer._fused.shape[1])
    assert bool(jnp.allclose(dma_out, ref_all, atol=1e-6, rtol=1e-6)), \
        "DMA-gather Pallas embedding lookup mismatch vs reference"

    print("KERNEL_OK")
</pallas_src>

<mosaic_0001>
module attributes {stable_mosaic.version = 11 : i64} {
  func.func @_onehot_gather_kernel(%arg0: i32, %arg1: i32, %arg2: memref<16x1xi32, #tpu.memory_space<vmem>>, %arg3: memref<40x128xbf16, #tpu.memory_space<vmem>>, %arg4: memref<16x128xf32, #tpu.memory_space<vmem>>, %arg5: memref<16x128xf32, #tpu.memory_space<vmem>>) attributes {dimension_semantics = [#tpu.dimension_semantics<parallel>, #tpu.dimension_semantics<arbitrary>], iteration_bounds = array<i64: 1, 1>, scalar_prefetch = 0 : i64, scratch_operands = 1 : i64, tpu.core_type = #tpu.core_type<tc>, window_params = [{transform_indices = @transform_0, window_bounds = array<i64: 16, 1>}, {transform_indices = @transform_1, window_bounds = array<i64: 40, 128>}, {transform_indices = @transform_2, window_bounds = array<i64: 16, 128>}]} {
    %c0_i32 = arith.constant 0 : i32
    %0 = arith.cmpi eq, %arg1, %c0_i32 : i32
    %1 = arith.extui %0 : i1 to i32
    %c0_i32_0 = arith.constant 0 : i32
    %2 = arith.cmpi ne, %1, %c0_i32_0 : i32
    scf.if %2 {
      %cst_10 = arith.constant 0.000000e+00 : f32
      %21 = vector.broadcast %cst_10 : f32 to vector<16x128xf32>
      %c0_11 = arith.constant 0 : index
      %c0_12 = arith.constant 0 : index
      %22 = vector.load %arg5[%c0_11, %c0_12] : memref<16x128xf32, #tpu.memory_space<vmem>>, vector<16x128xf32>
      tpu.vector_store %arg5[%c0_11, %c0_12], %21 {strides = array<i32>} : memref<16x128xf32, #tpu.memory_space<vmem>>, vector<16x128xf32>,
    } else {
    }
    %c0 = arith.constant 0 : index
    %c0_1 = arith.constant 0 : index
    %3 = vector.load %arg2[%c0, %c0_1] : memref<16x1xi32, #tpu.memory_space<vmem>>, vector<16x1xi32>
    %c40_i32 = arith.constant 40 : i32
    %4 = arith.muli %arg1, %c40_i32 : i32
    %5 = vector.broadcast %4 : i32 to vector<16x1xi32>
    %6 = arith.subi %3, %5 : vector<16x1xi32>
    %7 = tpu.iota {dimensions = array<i32: 1>} : vector<16x40xi32>
    %8 = vector.broadcast %6 : vector<16x1xi32> to vector<16x40xi32>
    %9 = arith.cmpi eq, %7, %8 : vector<16x40xi32>
    %10 = arith.extui %9 : vector<16x40xi1> to vector<16x40xi32>
    %11 = arith.sitofp %10 : vector<16x40xi32> to vector<16x40xf32>
    %12 = arith.truncf %11 : vector<16x40xf32> to vector<16x40xbf16>
    %c0_2 = arith.constant 0 : index
    %c0_3 = arith.constant 0 : index
    %13 = vector.load %arg5[%c0_2, %c0_3] : memref<16x128xf32, #tpu.memory_space<vmem>>, vector<16x128xf32>
    %c0_4 = arith.constant 0 : index
    %c0_5 = arith.constant 0 : index
    %14 = vector.load %arg3[%c0_4, %c0_5] : memref<40x128xbf16, #tpu.memory_space<vmem>>, vector<40x128xbf16>
    %cst = arith.constant dense<0.000000e+00> : vector<16x128xf32>
    %15 = tpu.matmul %12, %14, %cst {dimension_numbers = #tpu.dot_dimension_numbers<[1], [0], [0], [1], [0, 0, 1, 1], [], []>} : vector<16x40xbf16>, vector<40x128xbf16>, vector<16x128xf32> -> vector<16x128xf32>
    %16 = arith.addf %13, %15 : vector<16x128xf32>
    %c0_6 = arith.constant 0 : index
    %c0_7 = arith.constant 0 : index
    %17 = vector.load %arg5[%c0_6, %c0_7] : memref<16x128xf32, #tpu.memory_space<vmem>>, vector<16x128xf32>
    tpu.vector_store %arg5[%c0_6, %c0_7], %16 {strides = array<i32>} : memref<16x128xf32, #tpu.memory_space<vmem>>, vector<16x128xf32>,
    %c0_i32_8 = arith.constant 0 : i32
    %18 = arith.cmpi eq, %arg1, %c0_i32_8 : i32
    %19 = arith.extui %18 : i1 to i32
    %c0_i32_9 = arith.constant 0 : i32
    %20 = arith.cmpi ne, %19, %c0_i32_9 : i32
    scf.if %20 {
      %c0_10 = arith.constant 0 : index
      %c0_11 = arith.constant 0 : index
      %21 = vector.load %arg5[%c0_10, %c0_11] : memref<16x128xf32, #tpu.memory_space<vmem>>, vector<16x128xf32>
      %c0_12 = arith.constant 0 : index
      %c0_13 = arith.constant 0 : index
      %22 = vector.load %arg4[%c0_12, %c0_13] : memref<16x128xf32, #tpu.memory_space<vmem>>, vector<16x128xf32>
      tpu.vector_store %arg4[%c0_12, %c0_13], %21 {strides = array<i32>} : memref<16x128xf32, #tpu.memory_space<vmem>>, vector<16x128xf32>,
    } else {
    }
    return
  }
  func.func @transform_0(%arg0: i32, %arg1: i32) -> (i32, i32) {
    %c0_i32 = arith.constant 0 : i32
    %c0_i32_0 = arith.constant 0 : i32
    return %arg0, %c0_i32 : i32, i32
  }
  func.func @transform_1(%arg0: i32, %arg1: i32) -> (i32, i32) {
    %c0_i32 = arith.constant 0 : i32
    %c0_i32_0 = arith.constant 0 : i32
    return %arg1, %c0_i32 : i32, i32
  }
  func.func @transform_2(%arg0: i32, %arg1: i32) -> (i32, i32) {
    %c0_i32 = arith.constant 0 : i32
    %c0_i32_0 = arith.constant 0 : i32
    return %arg0, %c0_i32 : i32, i32
  }
}

</mosaic_0001>

<bundles_post_ra>
// kernel: tpu_custom_call.1
= control target key start
LH: loop header
LB: loop body
LE: loop exit
PB: predicated region body
PF: predicated region fallthrough
CT: control target
= control target key end

     0   :  { %v192_v1 = vmov 0   ;;  %v193_v2 = vmov 0.0   ;;  %s240_s0 = inlined_call_operand.vmem [shape: s32[16,1], index: 0, kind: input, shape index: {}]   ;;  %s241_s1 = inlined_call_operand.vmem [shape: bf16[40,128], index: 1, kind: input, shape index: {}]   ;;  %s242_s2 = inlined_call_operand.hbm [shape: f32[16,128], index: 2, kind: output, shape index: {}]  }
   0x1   :  { %v19_v0 = vld [vmem:[%s240_s0] sm:$0xff]  ;;  %164 = vset.pattern.permute.xlu0 %v192_v1  ;;  %148 = vmatprep.subr.bf16.mxu0 %v193_v2  ;;  %v20_v4 = vld [vmem:[%s240_s0 + $0x8] sm:$0xff] }
   0x2   :  { %v165_v3 = vld [vmem:[%s241_s1] sm:$0xff]   ;;  %28 = vperm.xlu0 %164, %v19_v0   ;;  %v166_v5 = vld [vmem:[%s241_s1 + $0x8] sm:$0xff]  }
   0x3   :  { %149 = vmatpush3.bf16.msra.mxu0 %v165_v3 }
   0x4   :  { %7 = vsyncpa [#allocation4], 0  ;;  %150 = vmatprep.subr.bf16.mxu0 %v193_v2  ;;  %v167_v6 = vld [vmem:[%s241_s1 + $0x10] ss:$0 sps:$4 sm:$0xff]   ;;  %vm66_vm0 = vcmask 1043456   ;;  %vm194_vm1 = vmmov 0   ;;  %v25_v8 = vlaneseq }
   0x5   :  { %v68_v7 = vsel %vm66_vm0, %v167_v6, 0  ;;  %154 = vmatprep.mubr.msk.bf16.mxu0 %vm194_vm1, %v193_v2  ;;  %vm62_vm4 = vcmask 326656   ;;  %s195_s0 = smov [#allocation3]  }
   0x6   :  { %31 = vperm.xlu0 %164, %v20_v4   ;;  %v26_v9 = vand.u32 127, %v25_v8  ;;  %s127_s1 = sshll.u32 %s195_s0, 4  ;;  %s128_s1 = int_to_ptr.vmem [resolvable:$true] %s127_s1 }
   0x7   :  { %151 = vmatpush3.bf16.msra.mxu0 %v166_v5  ;;  %s168_s19 = scalar_lea.vmem %s128_s1, 256  ;;  %p173_p1 = scmp.lt.s32.totalorder %s128_s1, %s128_s1 }
   0x8   :  { %152 = vmatprep.subr.bf16.mxu0 %v193_v2  ;;  %p169_p0 = scmp.ne.s32.totalorder %s128_s1, %s168_s19  ;;  %p174_p2 = scmp.lt.s32.totalorder %s168_s19, %s168_s19 }
   0xa   :  { %p175_p3 = por %p174_p2, %p173_p1 }
   0xb   :  { %153 = vmatpush3.bf16.msra.mxu0 %v68_v7 }
   0xc   :  { %p176_p4 = pnand %p175_p3, %p169_p0 }
  0x81   :  { %v29_v10 = vpop.permute.xlu0 %28 }
  0x82   :  { %vm33_vm2 = vcmp.eq.s32.totalorder %v26_v9, %v29_v10 }
  0x83   :  { %v138_v12 = vsel %vm33_vm2, 1.0, %v193_v2 }
  0x85   :  { %v32_v11 = vpop.permute.xlu0 %31 }
  0x86   :  { %vm34_vm3 = vcmp.eq.s32.totalorder %v26_v9, %v32_v11 }
  0x87   :  { %v139_v13 = vsel %vm34_vm3, 1.0, %v193_v2 }
  0x88   :  { %v39_v14 = vpack.c.bf16 %v139_v13, %v138_v12 }
  0x8a   :  { %155 = vmatmul.mubr.msk.bf16.vlgmr.msra.gmra.mrb[0].mxu0 %vm62_vm4, %v39_v14 }
 0x15d   :  { %v104_v15 = vpop.f32.mrb[0].mxu0 }
 0x15e   :  { %120 = vst [vmem:[#allocation3] sm:$0xff] %v104_v15  ;;  %v156_v16 = vpop.f32.mrb[1].mxu0 }
 0x15f   :  { %v107_v17 = vpop.f32.mrb[2].mxu0 }
 0x160   :  { %121 = vst [vmem:[#allocation3 + $0x8] sm:$0xff] %v107_v17  ;;  %v157_v18 = vpop.f32.mrb[3].mxu0 }
 0x161   :  { %179 = shalt.err (!%p176_p4)
}
 0x162   :  { %s180_s22 = scalar_lea.hbm %s242_s2, 256 }
 0x163   :  { %p181_p5 = scmp.ne.s32.totalorder %s242_s2, %s180_s22  ;;  %p184_p6 = scmp.lt.u32.totalorder %s180_s22, %s242_s2 }
 0x165   :  { %p186_p7 = pnand %p184_p6, %p181_p5 }
 0x167   :  { %189 = shalt.err (!%p186_p7)
}
 0x168   :  { %s196_s27 = smov 128   ;;  %s197_s28 = smov 8  }
 0x169   :  { %133 = dma.vmem_to_hbm [thread:$0]  %s128_s1, 256, %s242_s2, [#allocation4], %s196_s27, %s196_s27, %s197_s28  }
 0x16a   :  { %190 = dma.done.wait [#allocation4], 256  }
 0x16b   :  { %191 = vsyncadd [#allocation4], 4294967040 }
 0x16c   :  { %137 = vsyncpa [#allocation4], 1 }

</bundles_post_ra>
